<compile_context>
chip_gen: v7x
topology: tpu7x:2x2x1
jax: 0.10.0
libtpu: 0.0.40
codegen_flags: <defaults>
</compile_context>

<pallas_src>
import functools
import math

import jax
import jax.numpy as jnp
from jax.experimental import pallas as pl
from jax.experimental.pallas import tpu as pltpu

_COMPUTE_DTYPE = jnp.bfloat16


def _round_up(x, m):
    return ((x + m - 1) // m) * m


def _vmem_budget():
    """(tile-selection budget, vmem_limit_bytes) from this generation's VMEM."""
    cap = 64 * 1024 * 1024                       # conservative default (v7x per-TC)
    try:
        info = pltpu.get_tpu_info()
        cap = int(getattr(info, "vmem_capacity_bytes", cap)) or cap
    except Exception:
        pass
    # ~80 MiB budget / 96 MiB limit on 128-MiB parts (v5e/v6e); 40/48 MiB on v7x.
    return (cap * 5) // 8, (cap * 3) // 4


def _pick_width_tile(W, cout_full, cap=64):
    """Largest divisor of W that is <= cap and keeps the per-tile output lane
    count a multiple of 128 (unmasked lane-dense stores).  cap=64 keeps the
    structural-zero MXU work mem-bound on every generation at small Cin."""
    lane_q = 128 // math.gcd(cout_full, 128)
    for wt in range(min(cap, W), 0, -1):
        if W % wt == 0 and (wt == W or wt % lane_q == 0):
            return wt
    return W   # e.g. prime W > cap: fall back to a single width tile


def _pick_row_tile(H, lanes_in, lanes_out, budget):
    """Largest row tile (multiple of 16, <=512) whose per-step working set --
    double-buffered bf16 input / f32 output tiles, weights, and the in-kernel
    f32 accumulator + matmul temp -- fits the budget; minimal padded height."""
    def need(th):
        return (2 * th * lanes_in * 2              # bf16 input window, double-buffered
                + 2 * th * lanes_out * 4           # f32 output tile,  double-buffered
                + 2 * lanes_in * lanes_out * 2     # bf16 weights (worst case 2 buffers)
                + 2 * th * lanes_out * 4)          # in-kernel f32 acc + dot temp
    h_cap = max(16, min(512, _round_up(H, 16)))
    cands = [t for t in range(16, h_cap + 1, 16) if need(t) <= budget]
    if not cands:
        return 16   # smallest legal tile; vmem_limit keeps ~20% headroom over budget
    # minimal padded height first, then the largest tile (fewest grid steps)
    return min(cands, key=lambda t: (pl.cdiv(H, t) * t, -t))


def _shufconv_kernel(x_ref, g_ref, b_ref, out_ref):
    """One (batch, row-tile, width-tile) step: 3x3 conv + bias + clip(0,1).

    x_ref:   (1, TH, K*Lin)    bf16  K row-shifted halo'd width windows (im2col rows)
    g_ref:   (K*Lin, Wt*Cout)  bf16  block-banded Toeplitz weights, shuffle-ordered cols
    b_ref:   (1, Wt*Cout)      f32   bias tiled across the width tile
    out_ref: (1, TH, Wt*Cout)  f32   lane-dense output rows
    """
    acc = jnp.dot(x_ref[0], g_ref[...], preferred_element_type=jnp.float32)
    out_ref[0] = jnp.clip(acc + b_ref[...], 0.0, 1.0).astype(out_ref.dtype)


def shuf_conv_layer(x_nchw, weight_oihw, bias, *, kernel_size=3, scaling_factor=2):
    """ShufConvLayer forward (PyTorch semantics, groups=1).

    x_nchw:      (N, Cin, H, W)            float32
    weight_oihw: (out_ch*s*s, Cin, K, K)   float32
    bias:        (out_ch*s*s,)             float32
    returns:     (N, out_ch, H*s, W*s)     float32 (NCHW, same as PyTorch)
    """
    N, Cin, H, W = x_nchw.shape
    cout_full = weight_oihw.shape[0]
    K, s = kernel_size, scaling_factor
    out_ch = cout_full // (s * s)
    pad = K // 2

    budget, vmem_limit = _vmem_budget()

    # ---- tiling -------------------------------------------------------------
    Wt = _pick_width_tile(W, cout_full)
    nwt = W // Wt
    Win = Wt + K - 1                                     # halo'd input window width
    # Per-window lane width; pad to 128 so multi-tile input blocks stay aligned.
    Lin = Win * Cin if nwt == 1 else _round_up(Win * Cin, 128)
    lanes_in, lanes_out = K * Lin, Wt * cout_full

    TH = _pick_row_tile(H, lanes_in, lanes_out, budget)
    nht = pl.cdiv(H, TH)
    H_pad = nht * TH                                     # ragged last row tile -> zero pad

    # ---- layout glue (fused XLA) ---------------------------------------------
    # NCHW -> NHWC, bf16, zero-pad, gather overlapping width windows, then
    # concatenate the K row-shifted copies on the lane axis (im2col over taps).
    x_nhwc = jnp.transpose(x_nchw, (0, 2, 3, 1)).astype(_COMPUTE_DTYPE)
    rows = H_pad + K - 1
    Wq = (nwt - 1) * Wt + Win
    x_p = jnp.pad(x_nhwc, ((0, 0), (pad, rows - H - pad), (pad, Wq - W - pad), (0, 0)))
    col = jnp.arange(nwt)[:, None] * Wt + jnp.arange(Win)[None, :]        # (nwt, Win)
    x_w = x_p[:, :, col, :].reshape(N, rows, nwt, Win * Cin)
    if Lin > Win * Cin:
        x_w = jnp.pad(x_w, ((0, 0), (0, 0), (0, 0), (0, Lin - Win * Cin)))
    x_cat = jnp.concatenate([x_w[:, kh:kh + H_pad] for kh in range(K)], axis=-1)
    x_cat = x_cat.reshape(N, H_pad, nwt * lanes_in)

    # Block-banded Toeplitz weights (one per width tile; weight-only, tiny,
    # independent of the image size -- can be hoisted/cached across calls):
    #   G[kh*Lin + p*Cin + ci, ((co*s+sh)*Wt + w)*s + sw]
    #       = weight[co*s*s + sh*s + sw, ci, kh, p - w]   for 0 <= p - w < K
    w6 = weight_oihw.reshape(out_ch, s, s, Cin, K, K).astype(jnp.float32)
    sel = (jnp.arange(Win)[:, None, None]
           == jnp.arange(Wt)[None, :, None] + jnp.arange(K)[None, None, :]
           ).astype(jnp.float32)                                            # (Win, Wt, K)
    g7 = jnp.einsum('pwk,oabihk->hpioawb', sel, w6,
                    precision=jax.lax.Precision.HIGHEST)     # (K, Win, Cin, o, s, Wt, s)
    g = g7.reshape(K, Win * Cin, lanes_out)
    if Lin > Win * Cin:
        g = jnp.pad(g, ((0, 0), (0, Lin - Win * Cin), (0, 0)))
    g = g.reshape(lanes_in, lanes_out).astype(_COMPUTE_DTYPE)
    b_row = jnp.broadcast_to(bias.astype(jnp.float32).reshape(out_ch, s, 1, s),
                             (out_ch, s, Wt, s)).reshape(1, lanes_out)

    cost = pl.CostEstimate(
        flops=2 * N * H_pad * nwt * lanes_in * lanes_out,
        transcendentals=0,
        bytes_accessed=(x_cat.size * 2 + g.size * 2 + b_row.size * 4
                        + N * H_pad * nwt * lanes_out * 4))

    conv = pl.pallas_call(
        _shufconv_kernel,
        out_shape=jax.ShapeDtypeStruct((N, H_pad, nwt * lanes_out), jnp.float32),
        grid_spec=pltpu.PrefetchScalarGridSpec(
            num_scalar_prefetch=0,
            grid=(N, nht, nwt),
            in_specs=[
                pl.BlockSpec((1, TH, lanes_in), lambda n, i, j: (n, i, j)),
                # Grid-invariant weights / bias.  (Single-buffering them via
                # pipeline_mode=pl.Buffered(1) would halve their VMEM; kept on
                # the default pipeline mode for portability, and accounted for
                # with 2 buffers in _pick_row_tile.)
                pl.BlockSpec((lanes_in, lanes_out), lambda n, i, j: (0, 0)),
                pl.BlockSpec((1, lanes_out), lambda n, i, j: (0, 0)),
            ],
            out_specs=pl.BlockSpec((1, TH, lanes_out), lambda n, i, j: (n, i, j)),
        ),
        compiler_params=pltpu.CompilerParams(
            dimension_semantics=("parallel", "parallel", "parallel"),
            vmem_limit_bytes=vmem_limit),
        cost_estimate=cost,
    )(x_cat, g, b_row)

    # PixelShuffle: lanes already ordered ((c_out*s+sh)*Wt + w)*s + sw, so this
    # transpose moves contiguous Wt*s-element runs (coalesced) straight to NCHW.
    y = conv[:, :H].reshape(N, H, nwt, out_ch, s, Wt * s)
    y = jnp.transpose(y, (0, 3, 1, 4, 2, 5))
    return y.reshape(N, out_ch, H * s, W * s)


def _reference(x_nchw, weight_oihw, bias, *, kernel_size=3, scaling_factor=2):
    """Plain-JAX reference mirroring the PyTorch module."""
    pad = kernel_size // 2
    s = scaling_factor
    y = jax.lax.conv_general_dilated(
        x_nchw, weight_oihw, window_strides=(1, 1),
        padding=[(pad, pad), (pad, pad)],
        dimension_numbers=("NCHW", "OIHW", "NCHW"),
        precision=jax.lax.Precision.HIGHEST)
    y = jnp.clip(y + bias[None, :, None, None], 0.0, 1.0)
    N, Cf, H, W = y.shape
    out_ch = Cf // (s * s)
    y = y.reshape(N, out_ch, s, s, H, W)
    return jnp.transpose(y, (0, 1, 4, 2, 5, 3)).reshape(N, out_ch, H * s, W * s)


def _run_case(key, N, Cin, H, W, out_channels, K, s):
    cout_full = out_channels * s * s
    kx, kw, kb = jax.random.split(key, 3)
    x = jax.random.normal(kx, (N, Cin, H, W), dtype=jnp.float32)
    bound = 1.0 / ((Cin * K * K) ** 0.5)
    weight = jax.random.uniform(kw, (cout_full, Cin, K, K),
                                minval=-bound, maxval=bound, dtype=jnp.float32)
    bias = jax.random.uniform(kb, (cout_full,),
                              minval=-bound, maxval=bound, dtype=jnp.float32)

    fwd = jax.jit(functools.partial(shuf_conv_layer, kernel_size=K, scaling_factor=s))
    out = jax.block_until_ready(fwd(x, weight, bias))
    assert out.shape == (N, out_channels, H * s, W * s), out.shape

    # Kernel uses bf16 MXU operands with f32 accumulation:
    #  - tight check vs a reference fed bf16-rounded inputs/weights,
    #  - loose check vs the pure-f32 reference (covers the bf16 rounding).
    ref16 = _reference(x.astype(jnp.bfloat16).astype(jnp.float32),
                       weight.astype(jnp.bfloat16).astype(jnp.float32),
                       bias, kernel_size=K, scaling_factor=s)
    ref32 = _reference(x, weight, bias, kernel_size=K, scaling_factor=s)
    assert jnp.allclose(out, ref16, atol=2e-3, rtol=2e-3), "mismatch vs bf16 reference"
    assert jnp.allclose(out, ref32, atol=3e-2, rtol=3e-2), "mismatch vs f32 reference"


if __name__ == "__main__":
    key = jax.random.PRNGKey(0)
    k1, k2 = jax.random.split(key)
    # Small canonical config (in_channels=4, out_channels=4, k=3, s=2):
    # single width tile, height divisible by the row tile.
    _run_case(k1, N=2, Cin=4, H=32, W=32, out_channels=4, K=3, s=2)
    # Wider / ragged config exercising width tiling (multiple W tiles, padded
    # input windows) and a ragged (zero-padded) last row tile.
    _run_case(k2, N=2, Cin=4, H=40, W=256, out_channels=4, K=3, s=2)
    print("KERNEL_OK")
</pallas_src>

<mosaic_0001>
module attributes {stable_mosaic.version = 11 : i64} {
  func.func @_shufconv_kernel(%arg0: i32, %arg1: i32, %arg2: i32, %arg3: memref<1x32x408xbf16, #tpu.memory_space<vmem>>, %arg4: memref<408x512xbf16, #tpu.memory_space<vmem>>, %arg5: memref<1x512xf32, #tpu.memory_space<vmem>>, %arg6: memref<1x32x512xf32, #tpu.memory_space<vmem>>) attributes {dimension_semantics = [#tpu.dimension_semantics<parallel>, #tpu.dimension_semantics<parallel>, #tpu.dimension_semantics<parallel>], iteration_bounds = array<i64: 2, 1, 1>, scalar_prefetch = 0 : i64, scratch_operands = 0 : i64, tpu.core_type = #tpu.core_type<tc>, window_params = [{transform_indices = @transform_0, window_bounds = array<i64: 1, 32, 408>}, {pipeline_mode = #tpu.pipeline_mode<synchronous>, transform_indices = @transform_1, window_bounds = array<i64: 408, 512>}, {pipeline_mode = #tpu.pipeline_mode<synchronous>, transform_indices = @transform_2, window_bounds = array<i64: 1, 512>}, {transform_indices = @transform_3, window_bounds = array<i64: 1, 32, 512>}]} {
    %c0 = arith.constant 0 : index
    %c0_0 = arith.constant 0 : index
    %c0_1 = arith.constant 0 : index
    %0 = vector.load %arg3[%c0, %c0_0, %c0_1] : memref<1x32x408xbf16, #tpu.memory_space<vmem>>, vector<1x32x408xbf16>
    %1 = vector.shape_cast %0 : vector<1x32x408xbf16> to vector<32x408xbf16>
    %c0_2 = arith.constant 0 : index
    %c0_3 = arith.constant 0 : index
    %2 = vector.load %arg4[%c0_2, %c0_3] : memref<408x512xbf16, #tpu.memory_space<vmem>>, vector<408x512xbf16>
    %cst = arith.constant dense<0.000000e+00> : vector<32x512xf32>
    %3 = tpu.matmul %1, %2, %cst {dimension_numbers = #tpu.dot_dimension_numbers<[1], [0], [0], [1], [0, 0, 1, 1], [], []>} : vector<32x408xbf16>, vector<408x512xbf16>, vector<32x512xf32> -> vector<32x512xf32>
    %c0_4 = arith.constant 0 : index
    %c0_5 = arith.constant 0 : index
    %4 = vector.load %arg5[%c0_4, %c0_5] : memref<1x512xf32, #tpu.memory_space<vmem>>, vector<1x512xf32>
    %5 = vector.broadcast %4 : vector<1x512xf32> to vector<32x512xf32>
    %6 = arith.addf %3, %5 : vector<32x512xf32>
    %cst_6 = arith.constant 0.000000e+00 : f32
    %cst_7 = arith.constant 1.000000e+00 : f32
    %7 = vector.broadcast %cst_6 : f32 to vector<32x512xf32>
    %8 = arith.maximumf %7, %6 : vector<32x512xf32>
    %9 = vector.broadcast %cst_7 : f32 to vector<32x512xf32>
    %10 = arith.minimumf %9, %8 : vector<32x512xf32>
    %c0_8 = arith.constant 0 : index
    %c0_9 = arith.constant 0 : index
    %c0_10 = arith.constant 0 : index
    %11 = vector.load %arg6[%c0_8, %c0_9, %c0_10] : memref<1x32x512xf32, #tpu.memory_space<vmem>>, vector<1x32x512xf32>
    %12 = vector.shape_cast %11 : vector<1x32x512xf32> to vector<32x512xf32>
    %13 = vector.shape_cast %10 : vector<32x512xf32> to vector<1x32x512xf32>
    tpu.vector_store %arg6[%c0_8, %c0_9, %c0_10], %13 {strides = array<i32>} : memref<1x32x512xf32, #tpu.memory_space<vmem>>, vector<1x32x512xf32>,
    return
  }
  func.func @transform_0(%arg0: i32, %arg1: i32, %arg2: i32) -> (i32, i32, i32) {
    %c0_i32 = arith.constant 0 : i32
    return %arg0, %arg1, %arg2 : i32, i32, i32
  }
  func.func @transform_1(%arg0: i32, %arg1: i32, %arg2: i32) -> (i32, i32) {
    %c0_i32 = arith.constant 0 : i32
    %c0_i32_0 = arith.constant 0 : i32
    %c0_i32_1 = arith.constant 0 : i32
    return %c0_i32, %c0_i32_0 : i32, i32
  }
  func.func @transform_2(%arg0: i32, %arg1: i32, %arg2: i32) -> (i32, i32) {
    %c0_i32 = arith.constant 0 : i32
    %c0_i32_0 = arith.constant 0 : i32
    %c0_i32_1 = arith.constant 0 : i32
    return %c0_i32, %c0_i32_0 : i32, i32
  }
  func.func @transform_3(%arg0: i32, %arg1: i32, %arg2: i32) -> (i32, i32, i32) {
    %c0_i32 = arith.constant 0 : i32
    return %arg0, %arg1, %arg2 : i32, i32, i32
  }
}

</mosaic_0001>

<bundles_post_ra>
// kernel: shuf_conv_layer.1
= control target key start
LH: loop header
LB: loop body
LE: loop exit
PB: predicated region body
PF: predicated region fallthrough
CT: control target
= control target key end

     0   :  { %s1722_s12 = smov 0   ;;  %s1724_s13 = smov 0   ;;  %s2104_s0 = inlined_call_operand.vmem [shape: bf16[2,32,408], index: 0, kind: input, shape index: {}]   ;;  %s2105_s1 = inlined_call_operand.vmem [shape: bf16[408,512], index: 1, kind: input, shape index: {}]   ;;  %s2106_s2 = inlined_call_operand.vmem [shape: f32[1,512], index: 2, kind: input, shape index: {}]   ;;  %s2107_s3 = inlined_call_operand.vmem [shape: f32[2,32,512], index: 3, kind: output, shape index: {}]  }
   0x1   :  { %s1726_s14 = smov 0  }
   0x2 LB: > { %s32_s15 = sadd.s32 1, %s1696_s13  ;;  %p1329_p0 = scmp.ge.s32.totalorder %s1700_s14, 1  ;;  %s1700_s14 = sphi %s1726_s14, %s13_s14   ;;  %s1696_s13 = sphi %s1724_s13, %s2109_s13   ;;  %s1692_s12 = sphi %s1722_s12, %s2108_s12  }
   0x3   : > { %p34_p1 = scmp.ge.s32.totalorder %s32_s15, 2  ;;  %p175_p2 = scmp.lt.s32.totalorder %s1700_s14, 3 }
   0x5   : > { %s2111_s15 = smov (%p34_p1, %s32_s15), 0  ;;  %p176_p3 = pnand %p1329_p0, %p175_p2 }
   0x6   : > { %v1512_v0 = vld [vmem:[%s2105_s1 + $0x4] ss:$16 sps:$4 sm:$0xff] (!%p176_p3)   ;;  %v1514_v1 = vld [vmem:[%s2105_s1 + $0xc] ss:$16 sps:$4 sm:$0xff] (!%p176_p3)   ;;  %v1516_v2 = vld [vmem:[%s2105_s1] ss:$16 sps:$4 sm:$0xff] (!%p176_p3)  }
   0x7   : > { %179 = sbr.rel (%p176_p3) target bundleno = 341 (0x155), region = 32  ;;  %950 = vmatprep.subr.bf16.mxu0 (!%p176_p3), %v1512_v0  ;;  %v1517_v3 = vld [vmem:[%s2105_s1 + $0x8] ss:$16 sps:$4 sm:$0xff] (!%p176_p3)   ;;  %1056 = vmatprep.subr.bf16.mxu1 (!%p176_p3), %v1514_v1  ;;  %v1518_v4 = vld [vmem:[%s2105_s1 + $0x24] ss:$16 sps:$4 sm:$0xff] (!%p176_p3)   ;;  %p219_p4 = scmp.lt.s32.totalorder (!%p176_p3), %s1692_s12, 1 }
   0x8   : > { %951 = vmatpush1.bf16.msra.mxu0 (!%p176_p3), %v1516_v2  ;;  %1057 = vmatpush1.bf16.msra.mxu1 (!%p176_p3), %v1517_v3  ;;  %v1520_v5 = vld [vmem:[%s2105_s1 + $0x2c] ss:$16 sps:$4 sm:$0xff] (!%p176_p3)   ;;  %v1522_v6 = vld [vmem:[%s2105_s1 + $0x20] ss:$16 sps:$4 sm:$0xff] (!%p176_p3)   ;;  %v1523_v7 = vld [vmem:[%s2105_s1 + $0x28] ss:$16 sps:$4 sm:$0xff] (!%p176_p3)  }
   0x9   : > { %952 = vmatprep.subr.bf16.mxu0 (!%p176_p3), %v1518_v4  ;;  %1058 = vmatprep.subr.bf16.mxu1 (!%p176_p3), %v1520_v5  ;;  %v1524_v8 = vld [vmem:[%s2105_s1 + $0x44] ss:$16 sps:$4 sm:$0xff] (!%p176_p3)   ;;  %v1526_v9 = vld [vmem:[%s2105_s1 + $0x4c] ss:$16 sps:$4 sm:$0xff] (!%p176_p3)   ;;  %v1528_v10 = vld [vmem:[%s2105_s1 + $0x40] ss:$16 sps:$4 sm:$0xff] (!%p176_p3)  }
   0xa   : > { %v1529_v11 = vld [vmem:[%s2105_s1 + $0x48] ss:$16 sps:$4 sm:$0xff] (!%p176_p3)   ;;  %v1530_v12 = vld [vmem:[%s2105_s1 + $0x64] ss:$16 sps:$4 sm:$0xff] (!%p176_p3)   ;;  %v1532_v13 = vld [vmem:[%s2105_s1 + $0x6c] ss:$16 sps:$4 sm:$0xff] (!%p176_p3)  }
   0xb   : > { %v1534_v14 = vld [vmem:[%s2105_s1 + $0x60] ss:$16 sps:$4 sm:$0xff] (!%p176_p3)   ;;  %v1535_v15 = vld [vmem:[%s2105_s1 + $0x68] ss:$16 sps:$4 sm:$0xff] (!%p176_p3)   ;;  %v1536_v16 = vld [vmem:[%s2105_s1 + $0x84] ss:$16 sps:$4 sm:$0xff] (!%p176_p3)  }
   0xc   : > { %953 = vmatpush1.bf16.msra.mxu0 (!%p176_p3), %v1522_v6  ;;  %1059 = vmatpush1.bf16.msra.mxu1 (!%p176_p3), %v1523_v7  ;;  %v1538_v17 = vld [vmem:[%s2105_s1 + $0x8c] ss:$16 sps:$4 sm:$0xff] (!%p176_p3)   ;;  %v1540_v18 = vld [vmem:[%s2105_s1 + $0x80] ss:$16 sps:$4 sm:$0xff] (!%p176_p3)   ;;  %v1541_v19 = vld [vmem:[%s2105_s1 + $0x88] ss:$16 sps:$4 sm:$0xff] (!%p176_p3)  }
   0xd   : > { %954 = vmatprep.subr.bf16.mxu0 (!%p176_p3), %v1524_v8  ;;  %1060 = vmatprep.subr.bf16.mxu1 (!%p176_p3), %v1526_v9  ;;  %v1542_v20 = vld [vmem:[%s2105_s1 + $0xa4] ss:$16 sps:$4 sm:$0xff] (!%p176_p3)   ;;  %v1544_v21 = vld [vmem:[%s2105_s1 + $0xac] ss:$16 sps:$4 sm:$0xff] (!%p176_p3)   ;;  %v1546_v22 = vld [vmem:[%s2105_s1 + $0xa0] ss:$16 sps:$4 sm:$0xff] (!%p176_p3)  }
   0xe   : > { %v1547_v23 = vld [vmem:[%s2105_s1 + $0xa8] ss:$16 sps:$4 sm:$0xff]   ;;  %v1548_v24 = vld [vmem:[%s2105_s1 + $0xc4] ss:$16 sps:$4 sm:$0xff]   ;;  %v1550_v25 = vld [vmem:[%s2105_s1 + $0xcc] ss:$16 sps:$4 sm:$0xff]  }
   0xf   : > { %v1552_v26 = vld [vmem:[%s2105_s1 + $0xc0] ss:$16 sps:$4 sm:$0xff]   ;;  %v1553_v27 = vld [vmem:[%s2105_s1 + $0xc8] ss:$16 sps:$4 sm:$0xff]   ;;  %v1554_v28 = vld [vmem:[%s2105_s1 + $0xe4] ss:$16 sps:$4 sm:$0xff]  }
  0x10   : > { %955 = vmatpush1.bf16.msra.mxu0 %v1528_v10  ;;  %1061 = vmatpush1.bf16.msra.mxu1 %v1529_v11  ;;  %v1556_v29 = vld [vmem:[%s2105_s1 + $0xec] ss:$16 sps:$4 sm:$0xff]   ;;  %v1558_v30 = vld [vmem:[%s2105_s1 + $0xe0] ss:$16 sps:$4 sm:$0xff]   ;;  %v1559_v31 = vld [vmem:[%s2105_s1 + $0xe8] ss:$16 sps:$4 sm:$0xff]  }
  0x11   : > { %956 = vmatprep.subr.bf16.mxu0 %v1530_v12  ;;  %1062 = vmatprep.subr.bf16.mxu1 %v1532_v13  ;;  %v1560_v32 = vld [vmem:[%s2105_s1 + $0x104] ss:$16 sps:$4 sm:$0xff]   ;;  %v1562_v33 = vld [vmem:[%s2105_s1 + $0x10c] ss:$16 sps:$4 sm:$0xff]   ;;  %v1564_v34 = vld [vmem:[%s2105_s1 + $0x100] ss:$16 sps:$4 sm:$0xff]  }
  0x12   : > { %v1565_v35 = vld [vmem:[%s2105_s1 + $0x108] ss:$16 sps:$4 sm:$0xff]   ;;  %v1566_v36 = vld [vmem:[%s2105_s1 + $0x124] ss:$16 sps:$4 sm:$0xff]   ;;  %v1568_v37 = vld [vmem:[%s2105_s1 + $0x12c] ss:$16 sps:$4 sm:$0xff]  }
  0x13   : > { %s2113_s12 = smov (!%p219_p4, %s1692_s12), 1  ;;  %v1570_v38 = vld [vmem:[%s2105_s1 + $0x120] ss:$16 sps:$4 sm:$0xff]   ;;  %v1571_v39 = vld [vmem:[%s2105_s1 + $0x128] ss:$16 sps:$4 sm:$0xff]   ;;  %vm930_vm0 = vcmask 195584  }
  0x14   : > { %957 = vmatpush1.bf16.msra.mxu0 %v1534_v14  ;;  %1063 = vmatpush1.bf16.msra.mxu1 %v1535_v15  ;;  %v1572_v40 = vld [vmem:[%s2105_s1 + $0x144] ss:$16 sps:$4 sm:$0xff]   ;;  %v1574_v41 = vld [vmem:[%s2105_s1 + $0x14c] ss:$16 sps:$4 sm:$0xff]   ;;  %s1454_s4 = sshll.u32 %s2113_s12, 6  ;;  %vm937_vm1 = vcmask 1043456  }
  0x15   : > { %958 = vmatprep.subr.bf16.mxu0 %v1536_v16  ;;  %1064 = vmatprep.subr.bf16.mxu1 %v1538_v17  ;;  %v1576_v42 = vld [vmem:[%s2105_s1 + $0x140] ss:$16 sps:$4 sm:$0xff]   ;;  %v1577_v43 = vld [vmem:[%s2105_s1 + $0x148] ss:$16 sps:$4 sm:$0xff]   ;;  %v1578_v44 = vld [vmem:[%s2105_s1 + $0x164] ss:$16 sps:$4 sm:$0xff]   ;;  %s1885_s17 = scalar_lea.vmem %s2104_s0, %s1454_s4 }
  0x16   : > { %v1580_v45 = vld [vmem:[%s2105_s1 + $0x16c] ss:$16 sps:$4 sm:$0xff]   ;;  %v1582_v46 = vld [vmem:[%s2105_s1 + $0x160] ss:$16 sps:$4 sm:$0xff]   ;;  %v1583_v47 = vld [vmem:[%s2105_s1 + $0x168] ss:$16 sps:$4 sm:$0xff]  }
  0x17   : > { %v1610_v48 = vld [vmem:[%s1885_s17 + $0x4] ss:$16 sps:$4 sm:$0xff]   ;;  %v1586_v50 = vld [vmem:[%s2105_s1 + $0x18c] ss:$16 sps:$4 sm:$0xff]   ;;  %v1588_v51 = vld [vmem:[%s2105_s1 + $0x180] ss:$16 sps:$4 sm:$0xff]  }
  0x18   : > { %959 = vmatpush1.bf16.msra.mxu0 %v1540_v18  ;;  %1065 = vmatpush1.bf16.msra.mxu1 %v1541_v19  ;;  %v1584_v49 = vld [vmem:[%s2105_s1 + $0x184] ss:$16 sps:$4 sm:$0xff]   ;;  %v1589_v52 = vld [vmem:[%s2105_s1 + $0x188] ss:$16 sps:$4 sm:$0xff]   ;;  %v1592_v54 = vld [vmem:[%s2105_s1 + $0x1ac] ss:$16 sps:$4 sm:$0xff]  }
  0x19   : > { %960 = vmatprep.subr.bf16.mxu0 %v1542_v20  ;;  %1066 = vmatprep.subr.bf16.mxu1 %v1544_v21  ;;  %v1590_v53 = vld [vmem:[%s2105_s1 + $0x1a4] ss:$16 sps:$4 sm:$0xff]   ;;  %v1594_v55 = vld [vmem:[%s2105_s1 + $0x1a0] ss:$16 sps:$4 sm:$0xff]   ;;  %v1595_v56 = vld [vmem:[%s2105_s1 + $0x1a8] ss:$16 sps:$4 sm:$0xff]  }
  0x1a   : > { %982 = vmatprep.mubr.bf16.mxu0 %v1610_v48  ;;  %1088 = vmatprep.mubr.bf16.mxu1 %v1610_v48  ;;  %v1596_v57 = vld [vmem:[%s2105_s1 + $0x1c4] ss:$16 sps:$4 sm:$0xff]   ;;  %v1598_v58 = vld [vmem:[%s2105_s1 + $0x1cc] ss:$16 sps:$4 sm:$0xff]   ;;  %v1600_v59 = vld [vmem:[%s2105_s1 + $0x1c0] ss:$16 sps:$4 sm:$0xff]  }
  0x1b   : > { %v1601_v60 = vld [vmem:[%s2105_s1 + $0x1c8] ss:$16 sps:$4 sm:$0xff]   ;;  %v1602_v61 = vld [vmem:[%s2105_s1 + $0x1e4] ss:$16 sps:$4 sm:$0xff]   ;;  %v1604_v62 = vld [vmem:[%s2105_s1 + $0x1ec] ss:$16 sps:$4 sm:$0xff]  }
  0x1c   : > { %961 = vmatpush1.bf16.msra.mxu0 %v1546_v22  ;;  %1067 = vmatpush1.bf16.msra.mxu1 %v1547_v23  ;;  %v1606_v63 = vld [vmem:[%s2105_s1 + $0x1e0] ss:$16 sps:$4 sm:$0xff]   ;;  %v1607_v0 = vld [vmem:[%s2105_s1 + $0x1e8] ss:$16 sps:$4 sm:$0xff]   ;;  %v1613_v1 = vld [vmem:[%s2105_s1 + $0x204] ss:$16 sps:$4 sm:$0xff]  }
  0x1d   : > { %962 = vmatprep.subr.bf16.mxu0 %v1548_v24  ;;  %1068 = vmatprep.subr.bf16.mxu1 %v1550_v25  ;;  %v1616_v2 = vld [vmem:[%s2105_s1 + $0x20c] ss:$16 sps:$4 sm:$0xff]   ;;  %v1608_v3 = vld [vmem:[%s1885_s17] ss:$16 sps:$4 sm:$0xff]   ;;  %v1614_v5 = vld [vmem:[%s2105_s1 + $0x208] ss:$16 sps:$4 sm:$0xff]  }
  0x1e   : > { %v1611_v4 = vld [vmem:[%s2105_s1 + $0x200] ss:$16 sps:$4 sm:$0xff]   ;;  %v1619_v6 = vld [vmem:[%s2105_s1 + $0x224] ss:$16 sps:$4 sm:$0xff]   ;;  %v1622_v7 = vld [vmem:[%s2105_s1 + $0x22c] ss:$16 sps:$4 sm:$0xff]  }
  0x1f   : > { %v1659_v8 = vld [vmem:[%s1885_s17 + $0x24] ss:$16 sps:$4 sm:$0xff]   ;;  %v1617_v9 = vld [vmem:[%s2105_s1 + $0x220] ss:$16 sps:$4 sm:$0xff]   ;;  %v1620_v10 = vld [vmem:[%s2105_s1 + $0x228] ss:$16 sps:$4 sm:$0xff]  }
  0x20   : > { %963 = vmatpush1.bf16.msra.mxu0 %v1552_v26  ;;  %1069 = vmatpush1.bf16.msra.mxu1 %v1553_v27  ;;  %v1625_v11 = vld [vmem:[%s2105_s1 + $0x244] ss:$16 sps:$4 sm:$0xff]   ;;  %v1628_v12 = vld [vmem:[%s2105_s1 + $0x24c] ss:$16 sps:$4 sm:$0xff]   ;;  %v1661_v13 = vld [vmem:[%s1885_s17 + $0x20] ss:$16 sps:$4 sm:$0xff]  }
  0x21   : > { %964 = vmatprep.subr.bf16.mxu0 %v1554_v28  ;;  %1070 = vmatprep.subr.bf16.mxu1 %v1556_v29  ;;  %v1623_v14 = vld [vmem:[%s2105_s1 + $0x240] ss:$16 sps:$4 sm:$0xff]   ;;  %v1626_v15 = vld [vmem:[%s2105_s1 + $0x248] ss:$16 sps:$4 sm:$0xff]   ;;  %v1631_v16 = vld [vmem:[%s2105_s1 + $0x264] ss:$16 sps:$4 sm:$0xff]  }
  0x22   : > { %v1634_v17 = vld [vmem:[%s2105_s1 + $0x26c] ss:$16 sps:$4 sm:$0xff]   ;;  %v1629_v19 = vld [vmem:[%s2105_s1 + $0x260] ss:$16 sps:$4 sm:$0xff]   ;;  %v1632_v20 = vld [vmem:[%s2105_s1 + $0x268] ss:$16 sps:$4 sm:$0xff]  }
  0x23   : > { %v1674_v18 = vld [vmem:[%s1885_s17 + $0xc] ss:$16 sps:$4 sm:$0xff]   ;;  %v1637_v21 = vld [vmem:[%s2105_s1 + $0x284] ss:$16 sps:$4 sm:$0xff]   ;;  %v1635_v23 = vld [vmem:[%s2105_s1 + $0x280] ss:$16 sps:$4 sm:$0xff]  }
  0x24   : > { %965 = vmatpush1.bf16.msra.mxu0 %v1558_v30  ;;  %1071 = vmatpush1.bf16.msra.mxu1 %v1559_v31  ;;  %v1640_v22 = vld [vmem:[%s2105_s1 + $0x28c] ss:$16 sps:$4 sm:$0xff]   ;;  %v1638_v24 = vld [vmem:[%s2105_s1 + $0x288] ss:$16 sps:$4 sm:$0xff]   ;;  %v1643_v25 = vld [vmem:[%s2105_s1 + $0x2a4] ss:$16 sps:$4 sm:$0xff]  }
  0x25   : > { %966 = vmatprep.subr.bf16.mxu0 %v1560_v32  ;;  %1072 = vmatprep.subr.bf16.mxu1 %v1562_v33  ;;  %v1646_v26 = vld [vmem:[%s2105_s1 + $0x2ac] ss:$16 sps:$4 sm:$0xff]   ;;  %v1641_v27 = vld [vmem:[%s2105_s1 + $0x2a0] ss:$16 sps:$4 sm:$0xff]   ;;  %v1644_v28 = vld [vmem:[%s2105_s1 + $0x2a8] ss:$16 sps:$4 sm:$0xff]  }
  0x26   : > { %v1649_v29 = vld [vmem:[%s2105_s1 + $0x2c4] ss:$16 sps:$4 sm:$0xff]   ;;  %v1652_v30 = vld [vmem:[%s2105_s1 + $0x2cc] ss:$16 sps:$4 sm:$0xff]   ;;  %v1647_v31 = vld [vmem:[%s2105_s1 + $0x2c0] ss:$16 sps:$4 sm:$0xff]  }
  0x27   : > { %v1650_v32 = vld [vmem:[%s2105_s1 + $0x2c8] ss:$16 sps:$4 sm:$0xff]   ;;  %v1655_v33 = vld [vmem:[%s2105_s1 + $0x2e4] ss:$16 sps:$4 sm:$0xff]  }
  0x28   : > { %967 = vmatpush1.bf16.msra.mxu0 %v1564_v34  ;;  %1073 = vmatpush1.bf16.msra.mxu1 %v1565_v35  ;;  %v1658_v34 = vld [vmem:[%s2105_s1 + $0x2ec] ss:$16 sps:$4 sm:$0xff]   ;;  %v1653_v35 = vld [vmem:[%s2105_s1 + $0x2e0] ss:$16 sps:$4 sm:$0xff]  }
  0x29   : > { %968 = vmatprep.subr.bf16.mxu0 %v1566_v36  ;;  %1074 = vmatprep.subr.bf16.mxu1 %v1568_v37  ;;  %v1656_v36 = vld [vmem:[%s2105_s1 + $0x2e8] ss:$16 sps:$4 sm:$0xff]   ;;  %v1664_v37 = vld [vmem:[%s2105_s1 + $0x304] ss:$16 sps:$4 sm:$0xff]  }
  0x2c   : > { %969 = vmatpush1.bf16.msra.mxu0 %v1570_v38  ;;  %1075 = vmatpush1.bf16.msra.mxu1 %v1571_v39  ;;  %v1667_v38 = vld [vmem:[%s2105_s1 + $0x30c] ss:$16 sps:$4 sm:$0xff]   ;;  %v358_v39 = vld [vmem:[%s2105_s1 + $0x320] sm:$0xff] }
  0x2d   : > { %970 = vmatprep.subr.bf16.mxu0 %v1572_v40  ;;  %1076 = vmatprep.subr.bf16.mxu1 %v1574_v41  ;;  %v359_v40 = vld [vmem:[%s2105_s1 + $0x328] sm:$0xff]  ;;  %v1662_v41 = vld [vmem:[%s2105_s1 + $0x300] ss:$16 sps:$4 sm:$0xff]  }
  0x30   : > { %971 = vmatpush1.bf16.msra.mxu0 %v1576_v42  ;;  %1077 = vmatpush1.bf16.msra.mxu1 %v1577_v43  ;;  %v1665_v42 = vld [vmem:[%s2105_s1 + $0x308] ss:$16 sps:$4 sm:$0xff]   ;;  %v1443_v43 = vcombine.high %v358_v39, %v358_v39 }
  0x31   : > { %972 = vmatprep.subr.bf16.mxu0 %v1578_v44  ;;  %1078 = vmatprep.subr.bf16.mxu1 %v1580_v45  ;;  %v1445_v44 = vcombine.high %v359_v40, %v359_v40  ;;  %v1442_v45 = vcombine.low %v358_v39, %v358_v39 }
  0x34   : > { %973 = vmatpush1.bf16.msra.mxu0 %v1582_v46  ;;  %1079 = vmatpush1.bf16.msra.mxu1 %v1583_v47  ;;  %v1444_v46 = vcombine.low %v359_v40, %v359_v40  ;;  %v939_v47 = vsel %vm937_vm1, %v1442_v45, 0 }
  0x35   : > { %974 = vmatprep.subr.bf16.mxu0 %v1584_v49  ;;  %1080 = vmatprep.subr.bf16.mxu1 %v1586_v50  ;;  %v1672_v49 = vld [vmem:[%s1885_s17 + $0x8] ss:$16 sps:$4 sm:$0xff]   ;;  %v1675_v50 = vld [vmem:[%s1885_s17 + $0x2c] ss:$16 sps:$4 sm:$0xff]  }
  0x36   : > { %v945_v48 = vsel %vm937_vm1, %v1444_v46, 0 }
  0x38   : > { %975 = vmatpush1.bf16.msra.mxu0 %v1588_v51  ;;  %1081 = vmatpush1.bf16.msra.mxu1 %v1589_v52  ;;  %v1677_v51 = vld [vmem:[%s1885_s17 + $0x28] ss:$16 sps:$4 sm:$0xff]   ;;  %v362_v52 = vlaneseq  ;;  %s1455_s17 = sshll.u32 %s2113_s12, 7 }
  0x39   : > { %976 = vmatprep.subr.bf16.mxu0 %v1590_v53  ;;  %1082 = vmatprep.subr.bf16.mxu1 %v1592_v54  ;;  %s2077_s26 = scalar_lea.vmem %s2107_s3, %s1455_s17 }
  0x3a   : > { %v363_v53 = vshrl.u32 %v362_v52, 7 }
  0x3c   : > { %977 = vmatpush1.bf16.msra.mxu0 %v1594_v55  ;;  %1083 = vmatpush1.bf16.msra.mxu1 %v1595_v56  ;;  %v364_v54 = vsub.s32 0, %v363_v53  ;;  %v372_v55 = vsub.s32 2, %v363_v53  ;;  %v360_v56 = vld [vmem:[%s2106_s2] sm:$0xf] }
  0x3d   : > { %978 = vmatprep.subr.bf16.mxu0 %v1596_v57  ;;  %1084 = vmatprep.subr.bf16.mxu1 %v1598_v58  ;;  %v368_v57 = vsub.s32 1, %v363_v53  ;;  %v376_v58 = vsub.s32 3, %v363_v53 }
  0x40   : > { %979 = vmatpush1.bf16.msra.mxu0 %v1600_v59  ;;  %1085 = vmatpush1.bf16.msra.mxu1 %v1601_v60  ;;  %v365_v59 = vrot.slane %v360_v56, %v364_v54  ;;  %v373_v60 = vrot.slane %v360_v56, %v372_v55 }
  0x41   : > { %980 = vmatprep.subr.bf16.mxu0 %v1602_v61  ;;  %1086 = vmatprep.subr.bf16.mxu1 %v1604_v62  ;;  %v369_v61 = vrot.slane %v360_v56, %v368_v57  ;;  %v377_v62 = vrot.slane %v360_v56, %v376_v58 }
  0x44   : > { %981 = vmatpush1.bf16.msra.mxu0 %v1606_v63  ;;  %1087 = vmatpush1.bf16.msra.mxu1 %v1607_v0 }
  0x45   : > { %1003 = vmatprep.subr.bf16.mxu0 %v1613_v1  ;;  %1109 = vmatprep.subr.bf16.mxu1 %v1616_v2 }
  0x47   : > { %983 = vmatmul.mubr.bf16.vlgmr.msra.gmra.mrb[0].mxu0 %v1608_v3  ;;  %1089 = vmatmul.mubr.bf16.vlgmr.msra.gmra.mrb[0].mxu1 %v1608_v3 }
  0x48   : > { %1004 = vmatpush1.bf16.msra.mxu0 %v1611_v4  ;;  %1110 = vmatpush1.bf16.msra.mxu1 %v1614_v5 }
  0x49   : > { %1005 = vmatprep.subr.bf16.mxu0 %v1619_v6  ;;  %1111 = vmatprep.subr.bf16.mxu1 %v1622_v7 }
  0x4a   : > { %992 = vmatprep.mubr.bf16.mxu0 %v1659_v8  ;;  %1098 = vmatprep.mubr.bf16.mxu1 %v1659_v8 }
  0x4c   : > { %1006 = vmatpush1.bf16.msra.mxu0 %v1617_v9  ;;  %1112 = vmatpush1.bf16.msra.mxu1 %v1620_v10 }
  0x4d   : > { %1007 = vmatprep.subr.bf16.mxu0 %v1625_v11  ;;  %1113 = vmatprep.subr.bf16.mxu1 %v1628_v12 }
  0x4f   : > { %993 = vmatmul.mubr.bf16.gmra.mrb[4].mxu0 %v1661_v13  ;;  %1099 = vmatmul.mubr.bf16.gmra.mrb[4].mxu1 %v1661_v13 }
  0x50   : > { %1008 = vmatpush1.bf16.msra.mxu0 %v1623_v14  ;;  %1114 = vmatpush1.bf16.msra.mxu1 %v1626_v15 }
  0x51   : > { %1009 = vmatprep.subr.bf16.mxu0 %v1631_v16  ;;  %1115 = vmatprep.subr.bf16.mxu1 %v1634_v17 }
  0x52   : > { %1447 = vmatprep.mubr.msk.bf16.mxu0 %vm930_vm0, %v1674_v18  ;;  %1450 = vmatprep.mubr.msk.bf16.mxu1 %vm930_vm0, %v1674_v18 }
  0x54   : > { %1010 = vmatpush1.bf16.msra.mxu0 %v1629_v19  ;;  %1116 = vmatpush1.bf16.msra.mxu1 %v1632_v20 }
  0x55   : > { %1011 = vmatprep.subr.bf16.mxu0 %v1637_v21  ;;  %1117 = vmatprep.subr.bf16.mxu1 %v1640_v22 }
  0x58   : > { %1012 = vmatpush1.bf16.msra.mxu0 %v1635_v23  ;;  %1118 = vmatpush1.bf16.msra.mxu1 %v1638_v24 }
  0x59   : > { %1013 = vmatprep.subr.bf16.mxu0 %v1643_v25  ;;  %1119 = vmatprep.subr.bf16.mxu1 %v1646_v26 }
  0x5c   : > { %1014 = vmatpush1.bf16.msra.mxu0 %v1641_v27  ;;  %1120 = vmatpush1.bf16.msra.mxu1 %v1644_v28 }
  0x5d   : > { %1015 = vmatprep.subr.bf16.mxu0 %v1649_v29  ;;  %1121 = vmatprep.subr.bf16.mxu1 %v1652_v30 }
  0x60   : > { %1016 = vmatpush1.bf16.msra.mxu0 %v1647_v31  ;;  %1122 = vmatpush1.bf16.msra.mxu1 %v1650_v32 }
  0x61   : > { %1017 = vmatprep.subr.bf16.mxu0 %v1655_v33  ;;  %1123 = vmatprep.subr.bf16.mxu1 %v1658_v34 }
  0x64   : > { %1018 = vmatpush1.bf16.msra.mxu0 %v1653_v35  ;;  %1124 = vmatpush1.bf16.msra.mxu1 %v1656_v36 }
  0x65   : > { %1019 = vmatprep.subr.bf16.mxu0 %v1664_v37  ;;  %1125 = vmatprep.subr.bf16.mxu1 %v1667_v38 }
  0x68   : > { %1020 = vmatpush1.bf16.msra.mxu0 %v1662_v41  ;;  %1126 = vmatpush1.bf16.msra.mxu1 %v1665_v42 }
  0x69   : > { %1446 = vmatprep.subr.msk.bf16.mxu0 %vm937_vm1, %v1443_v43  ;;  %1449 = vmatprep.subr.msk.bf16.mxu1 %vm937_vm1, %v1445_v44 }
  0x6c   : > { %1022 = vmatpush1.bf16.msra.mxu0 %v939_v47  ;;  %1128 = vmatpush1.bf16.msra.mxu1 %v945_v48 }
  0x6f   : > { %1036 = vmatmul.mubr.bf16.vlgmr.msra.gmra.mrb[0].mxu0 %v1672_v49  ;;  %1142 = vmatmul.mubr.bf16.vlgmr.msra.gmra.mrb[0].mxu1 %v1672_v49 }
  0x70   : > { %1448 = vmatprep.mubr.msk.bf16.mxu0 %vm930_vm0, %v1675_v50  ;;  %1451 = vmatprep.mubr.msk.bf16.mxu1 %vm930_vm0, %v1675_v50 }
  0x77   : > { %1046 = vmatmul.mubr.bf16.gmra.mrb[4].mxu0 %v1677_v51  ;;  %1152 = vmatmul.mubr.bf16.gmra.mrb[4].mxu1 %v1677_v51 }
 0x142   : > { %v1037_v63 = vpop.f32.mrb[0].mxu0  ;;  %v1143_v0 = vpop.f32.mrb[0].mxu1 }
 0x143   : > { %v1456_v1 = vadd.f32 %v1037_v63, %v365_v59  ;;  %v1464_v2 = vadd.f32 %v1143_v0, %v373_v60  ;;  %v1039_v3 = vpop.f32.mrb[1].mxu0  ;;  %v1145_v4 = vpop.f32.mrb[1].mxu1 }
 0x144   : > { %v1457_v5 = vadd.f32 %v1039_v3, %v369_v61  ;;  %v1465_v6 = vadd.f32 %v1145_v4, %v377_v62  ;;  %v1041_v7 = vpop.f32.mrb[2].mxu0  ;;  %v1147_v8 = vpop.f32.mrb[2].mxu1 }
 0x145   : > { %v1162_v9 = vmax.f32 %v1456_v1, 0.0  ;;  %v1164_v10 = vmax.f32 %v1464_v2, 0.0  ;;  %v1458_v11 = vadd.f32 %v1041_v7, %v365_v59  ;;  %v1466_v12 = vadd.f32 %v1147_v8, %v373_v60  ;;  %v1043_v13 = vpop.f32.mrb[3].mxu0  ;;  %v1149_v14 = vpop.f32.mrb[3].mxu1 }
 0x146   : > { %v1163_v15 = vmax.f32 %v1457_v5, 0.0  ;;  %v1165_v16 = vmax.f32 %v1465_v6, 0.0  ;;  %v1459_v17 = vadd.f32 %v1043_v13, %v369_v61  ;;  %v1467_v18 = vadd.f32 %v1149_v14, %v377_v62 }
 0x147   : > { %v1178_v19 = vmin.f32 %v1162_v9, 1.0  ;;  %v1180_v20 = vmin.f32 %v1164_v10, 1.0  ;;  %v1166_v21 = vmax.f32 %v1458_v11, 0.0  ;;  %v1168_v22 = vmax.f32 %v1466_v12, 0.0 }
 0x148   : > { %v1179_v23 = vmin.f32 %v1163_v15, 1.0  ;;  %v1181_v24 = vmin.f32 %v1165_v16, 1.0  ;;  %v1167_v25 = vmax.f32 %v1459_v17, 0.0  ;;  %v1169_v26 = vmax.f32 %v1467_v18, 0.0 }
 0x149   : > { %1194 = vst [vmem:[%s2077_s26] sm:$0xff] %v1178_v19  ;;  %1196 = vst [vmem:[%s2077_s26 + $0x10] sm:$0xff] %v1180_v20  ;;  %v1182_v27 = vmin.f32 %v1166_v21, 1.0  ;;  %v1184_v28 = vmin.f32 %v1168_v22, 1.0 }
 0x14a   : > { %1195 = vst [vmem:[%s2077_s26 + $0x8] sm:$0xff] %v1179_v23  ;;  %1197 = vst [vmem:[%s2077_s26 + $0x18] sm:$0xff] %v1181_v24  ;;  %v1183_v29 = vmin.f32 %v1167_v25, 1.0  ;;  %v1185_v30 = vmin.f32 %v1169_v26, 1.0  ;;  %v1047_v31 = vpop.f32.mrb[4].mxu0  ;;  %v1153_v32 = vpop.f32.mrb[4].mxu1 }
 0x14b   : > { %1198 = vst [vmem:[%s2077_s26 + $0x20] sm:$0xff] %v1182_v27  ;;  %1200 = vst [vmem:[%s2077_s26 + $0x30] sm:$0xff] %v1184_v28  ;;  %v1460_v33 = vadd.f32 %v1047_v31, %v365_v59  ;;  %v1468_v34 = vadd.f32 %v1153_v32, %v373_v60  ;;  %v1049_v35 = vpop.f32.mrb[5].mxu0  ;;  %v1155_v36 = vpop.f32.mrb[5].mxu1 }
 0x14c   : > { %1199 = vst [vmem:[%s2077_s26 + $0x28] sm:$0xff] %v1183_v29  ;;  %1201 = vst [vmem:[%s2077_s26 + $0x38] sm:$0xff] %v1185_v30  ;;  %v1461_v37 = vadd.f32 %v1049_v35, %v369_v61  ;;  %v1469_v38 = vadd.f32 %v1155_v36, %v377_v62  ;;  %v1051_v39 = vpop.f32.mrb[6].mxu0  ;;  %v1157_v40 = vpop.f32.mrb[6].mxu1 }
 0x14d   : > { %v1170_v41 = vmax.f32 %v1460_v33, 0.0  ;;  %v1172_v42 = vmax.f32 %v1468_v34, 0.0  ;;  %v1462_v43 = vadd.f32 %v1051_v39, %v365_v59  ;;  %v1470_v44 = vadd.f32 %v1157_v40, %v373_v60  ;;  %v1053_v45 = vpop.f32.mrb[7].mxu0  ;;  %v1159_v46 = vpop.f32.mrb[7].mxu1 }
 0x14e   : > { %v1171_v47 = vmax.f32 %v1461_v37, 0.0  ;;  %v1173_v48 = vmax.f32 %v1469_v38, 0.0  ;;  %v1463_v49 = vadd.f32 %v1053_v45, %v369_v61  ;;  %v1471_v50 = vadd.f32 %v1159_v46, %v377_v62 }
 0x14f   : > { %v1186_v51 = vmin.f32 %v1170_v41, 1.0  ;;  %v1188_v52 = vmin.f32 %v1172_v42, 1.0  ;;  %v1174_v53 = vmax.f32 %v1462_v43, 0.0  ;;  %v1176_v54 = vmax.f32 %v1470_v44, 0.0 }
 0x150   : > { %v1187_v55 = vmin.f32 %v1171_v47, 1.0  ;;  %v1189_v56 = vmin.f32 %v1173_v48, 1.0  ;;  %v1175_v57 = vmax.f32 %v1463_v49, 0.0  ;;  %v1177_v58 = vmax.f32 %v1471_v50, 0.0 }
 0x151   : > { %1202 = vst [vmem:[%s2077_s26 + $0x40] sm:$0xff] %v1186_v51  ;;  %1204 = vst [vmem:[%s2077_s26 + $0x50] sm:$0xff] %v1188_v52  ;;  %v1190_v59 = vmin.f32 %v1174_v53, 1.0  ;;  %v1192_v60 = vmin.f32 %v1176_v54, 1.0 }
 0x152   : > { %1203 = vst [vmem:[%s2077_s26 + $0x48] sm:$0xff] %v1187_v55  ;;  %1205 = vst [vmem:[%s2077_s26 + $0x58] sm:$0xff] %v1189_v56  ;;  %v1191_v61 = vmin.f32 %v1175_v57, 1.0  ;;  %v1193_v62 = vmin.f32 %v1177_v58, 1.0 }
 0x153   : > { %1206 = vst [vmem:[%s2077_s26 + $0x60] sm:$0xff] %v1190_v59  ;;  %1208 = vst [vmem:[%s2077_s26 + $0x70] sm:$0xff] %v1192_v60 }
 0x154   : > { %1207 = vst [vmem:[%s2077_s26 + $0x68] sm:$0xff] %v1191_v61  ;;  %1209 = vst [vmem:[%s2077_s26 + $0x78] sm:$0xff] %v1193_v62 }
 0x155 PF: > { %s13_s14 = sadd.s32 1, %s1700_s14   ;;  %s2108_s12 = smov %s1696_s13 }
 0x156   : > { %p10_p5 = scmp.ge.s32.totalorder %s13_s14, 4   ;;  %s2109_s13 = smov %s2111_s15 }
 0x158   :  { %12 = sbr.rel (!%p10_p5) target bundleno = 2 (0x2), region = 62 }

</bundles_post_ra>
